<compile_context>
chip_gen: v6e
topology: v6e:2x2x1
jax: 0.10.0
libtpu: 0.0.40
codegen_flags: <defaults>
</compile_context>

<pallas_src>
import functools

import jax
import jax.numpy as jnp
from jax.experimental import pallas as pl
from jax.experimental.pallas import tpu as pltpu

_NUM_ROWS = 8  # uu, uv, vv, alpha, beta, gamma, dist, pad


def _round_up(x, m):
    return (x + m - 1) // m * m


def _poincare_scalars(eps, uu, uv, vv):
    """Shared per-pair scalar math (matches the PyTorch reference)."""
    alpha = 1.0 - uu
    alpha = jnp.where(alpha <= 0.0, eps, alpha)        # alpha[alpha <= 0] = EPS
    beta = 1.0 - vv
    beta = jnp.where(beta <= 0.0, eps, beta)           # beta[beta <= 0] = EPS
    # Merged divide: /(alpha*beta) instead of /alpha/beta (one vdiv).
    gamma = 1.0 + 2.0 * (uu - 2.0 * uv + vv) / (alpha * beta)
    gamma = jnp.maximum(gamma, 1.0)                    # gamma[gamma < 1] = 1
    dist = jnp.log(gamma + jnp.sqrt(gamma * gamma - 1.0))   # arcosh(gamma)
    return uu, uv, vv, alpha, beta, gamma, dist


def _poincare_fused_kernel(eps, tab_ref, l_ref, r_ref, out_ref):
    """Fused gather + distance. Pair index on lanes, embed dim on sublanes.

    tab_ref : (d_pad, vocab_pad) f32  transposed table, VMEM-resident
    l_ref   : (1, tn) int32           left indices for this tile
    r_ref   : (1, tn) int32           right indices for this tile
    out_ref : (8, tn) f32             packed per-pair scalars (lane-dense)
    """
    vocab_pad = tab_ref.shape[1]
    tn = l_ref.shape[1]
    tab_t = tab_ref[...]

    # One-hot gather on the MXU: u_t[:, j] = Emb[left_idx[j]].  The one-hot
    # entries (exact 0/1) plus precision=HIGHEST keep the f32 table values
    # exact through the matmul, so this is a true gather (1e-5 check holds).
    row_ids = jax.lax.broadcasted_iota(jnp.int32, (vocab_pad, tn), 0)
    oh_l = jnp.where(row_ids == l_ref[...], 1.0, 0.0).astype(jnp.float32)
    oh_r = jnp.where(row_ids == r_ref[...], 1.0, 0.0).astype(jnp.float32)
    u_t = jnp.dot(tab_t, oh_l, preferred_element_type=jnp.float32,
                  precision=jax.lax.Precision.HIGHEST)      # (d_pad, tn)
    v_t = jnp.dot(tab_t, oh_r, preferred_element_type=jnp.float32,
                  precision=jax.lax.Precision.HIGHEST)

    # Reductions over the embedding (sublane) axis -> lane-dense (1, tn) rows.
    uu = jnp.sum(u_t * u_t, axis=0, keepdims=True)
    vv = jnp.sum(v_t * v_t, axis=0, keepdims=True)
    uv = jnp.sum(u_t * v_t, axis=0, keepdims=True)

    vals = _poincare_scalars(eps, uu, uv, vv)
    for r, val in enumerate(vals):                 # sublane-slice stores
        out_ref[r:r + 1, :] = val
    out_ref[len(vals):, :] = jnp.zeros_like(uu)    # pad row


def _poincare_rowmajor_kernel(eps, u_ref, v_ref, out_ref):
    """Fallback path (vocab too large for VMEM): pre-gathered row-major tiles.

    u_ref / v_ref : (tn, d_pad) f32   straight from the gathered arrays
                                      (no wrapper transpose/pad HBM pass)
    out_ref       : (tn, 8) f32
    """
    u = u_ref[...]
    v = v_ref[...]
    uu = jnp.sum(u * u, axis=1, keepdims=True)     # (tn, 1)
    vv = jnp.sum(v * v, axis=1, keepdims=True)
    uv = jnp.sum(u * v, axis=1, keepdims=True)
    vals = _poincare_scalars(eps, uu, uv, vv)
    for r, val in enumerate(vals):
        out_ref[:, r:r + 1] = val
    out_ref[:, len(vals):] = jnp.zeros_like(uu)


def poincare_forward(embeddings, left_idx, right_idx, *, eps=1e-5,
                     tile_n=4096, fuse_gather=None):
    """Returns ((uu, uv, vv, alpha, beta, gamma), dists), each of shape (N,)."""
    emb = embeddings.astype(jnp.float32)
    vocab, d = emb.shape
    n = int(left_idx.shape[0])

    d_pad = _round_up(d, 8)
    vocab_pad = _round_up(vocab, 8)

    if fuse_gather is None:
        # Fuse the gather whenever the transposed table comfortably fits VMEM
        # and the one-hot intermediate stays cheap; otherwise XLA gathers.
        fuse_gather = (vocab_pad * d_pad * 4 <= (2 << 20)) and vocab_pad <= 4096

    # ---- Tile selection: pair index N lives on the 128-wide lane axis ----
    n128 = _round_up(n, 128)
    tn = min(_round_up(tile_n, 128), n128)
    if n128 >= 256:
        # Keep >= 2 grid steps so the "parallel" axis can shard across both
        # TensorCores on v7x; a single giant tile would idle one TC.
        tn = min(tn, _round_up(pl.cdiv(n128, 2), 128))

    def vmem_footprint(tn_):
        # Rough per-step bytes: double-buffered I/O + main intermediates.
        if fuse_gather:
            io = (2 * 2 * 1 + 2 * _NUM_ROWS) * tn_ * 4          # idx in + out
            work = (2 * vocab_pad + 2 * d_pad + 16) * tn_ * 4    # one-hots, u_t, v_t
            work += 2 * vocab_pad * d_pad * 4                    # resident table
        else:
            io = (2 * 2 * d_pad + 2 * _NUM_ROWS) * tn_ * 4       # u, v in + out
            work = (2 * d_pad + 16) * tn_ * 4
        return io + work

    # Conservative budget that fits the default scoped-VMEM limit on every
    # generation (v5e 16 MiB, v6e/v7x 32 MiB scoped; v7x 64 MiB physical).
    while tn > 128 and vmem_footprint(tn) > 10 * 1024 * 1024:
        tn = _round_up(tn // 2, 128)

    n_pad = _round_up(n, tn)
    grid = (n_pad // tn,)

    compiler_params = pltpu.CompilerParams(
        dimension_semantics=("parallel",),
        vmem_limit_bytes=32 * 1024 * 1024)

    if fuse_gather:
        # HBM traffic per pair: 8 B of indices in + 32 B of scalars out
        # (plus the table once), vs ~3-4 passes over 2*D*4 bytes before.
        tab_t = jnp.pad(emb.T, ((0, d_pad - d), (0, vocab_pad - vocab)))
        li = jnp.pad(left_idx.astype(jnp.int32), (0, n_pad - n)).reshape(1, n_pad)
        ri = jnp.pad(right_idx.astype(jnp.int32), (0, n_pad - n)).reshape(1, n_pad)

        packed = pl.pallas_call(
            functools.partial(_poincare_fused_kernel, float(eps)),
            out_shape=jax.ShapeDtypeStruct((_NUM_ROWS, n_pad), jnp.float32),
            grid_spec=pltpu.PrefetchScalarGridSpec(
                num_scalar_prefetch=0,
                grid=grid,
                in_specs=[
                    pl.BlockSpec((d_pad, vocab_pad), lambda i: (0, 0)),
                    pl.BlockSpec((1, tn), lambda i: (0, i)),
                    pl.BlockSpec((1, tn), lambda i: (0, i)),
                ],
                out_specs=pl.BlockSpec((_NUM_ROWS, tn), lambda i: (0, i)),
            ),
            compiler_params=compiler_params,
        )(tab_t, li, ri)
        rows = [packed[r, :n] for r in range(7)]
    else:
        # TODO(synk): for very large vocabularies a manual per-row DMA gather
        # (scalar-prefetched indices + pl.ANY table) could also remove this
        # XLA gather pass; per-row DMA issue overhead makes it a loss at small D.
        u = jnp.take(emb, left_idx, axis=0)                       # (N, D)
        v = jnp.take(emb, right_idx, axis=0)
        u = jnp.pad(u, ((0, n_pad - n), (0, d_pad - d)))
        v = jnp.pad(v, ((0, n_pad - n), (0, d_pad - d)))
        row_spec = pl.BlockSpec((tn, d_pad), lambda i: (i, 0))    # contiguous HBM tile

        packed = pl.pallas_call(
            functools.partial(_poincare_rowmajor_kernel, float(eps)),
            out_shape=jax.ShapeDtypeStruct((n_pad, _NUM_ROWS), jnp.float32),
            grid_spec=pltpu.PrefetchScalarGridSpec(
                num_scalar_prefetch=0,
                grid=grid,
                in_specs=[row_spec, row_spec],
                out_specs=pl.BlockSpec((tn, _NUM_ROWS), lambda i: (i, 0)),
            ),
            compiler_params=compiler_params,
        )(u, v)
        rows = [packed[:n, r] for r in range(7)]

    uu, uv, vv, alpha, beta, gamma, dist = rows
    return (uu, uv, vv, alpha, beta, gamma), dist


def _reference(embeddings, left_idx, right_idx, eps=1e-5):
    u = jnp.take(embeddings, left_idx, axis=0)
    v = jnp.take(embeddings, right_idx, axis=0)
    uu = jnp.sum(u * u, -1)
    vv = jnp.sum(v * v, -1)
    uv = jnp.sum(u * v, -1)
    alpha = 1 - uu
    alpha = jnp.where(alpha <= 0, eps, alpha)
    beta = 1 - vv
    beta = jnp.where(beta <= 0, eps, beta)
    gamma = 1 + 2 * (uu - 2 * uv + vv) / alpha / beta
    gamma = jnp.where(gamma < 1.0, 1.0, gamma)
    dist = jnp.log(gamma + jnp.sqrt(gamma * gamma - 1))
    return (uu, uv, vv, alpha, beta, gamma), dist


if __name__ == "__main__":
    # Deterministic synthetic parameters (module __init__: uniform(-init, init)
    # embedding table of shape (vocab, embed_dims)).
    vocab = 64          # len(dc.word2idx)
    embed_dims = 32     # args.embed_dims
    init = 0.1          # args.init
    eps = 1e-5          # args.EPS
    n_pairs = 8

    key = jax.random.PRNGKey(0)
    k_emb, k_l, k_r = jax.random.split(key, 3)
    concept_embeddings = jax.random.uniform(
        k_emb, (vocab, embed_dims), dtype=jnp.float32,
        minval=-init, maxval=init)
    left_idx = jax.random.randint(k_l, (n_pairs,), 0, vocab, dtype=jnp.int32)
    right_idx = jax.random.randint(k_r, (n_pairs,), 0, vocab, dtype=jnp.int32)

    ref_tuple, ref_dists = _reference(concept_embeddings, left_idx, right_idx, eps)

    # Primary (fused-gather) path.
    result_tuple, dists = poincare_forward(
        concept_embeddings, left_idx, right_idx, eps=eps)
    jax.block_until_ready(dists)
    for got, want in zip(result_tuple + (dists,), ref_tuple + (ref_dists,)):
        assert jnp.allclose(got, want, atol=1e-5, rtol=1e-5), (got, want)

    # Fallback (pre-gathered, row-major tiles) path — exercised for coverage.
    result_tuple_f, dists_f = poincare_forward(
        concept_embeddings, left_idx, right_idx, eps=eps, fuse_gather=False)
    jax.block_until_ready(dists_f)
    for got, want in zip(result_tuple_f + (dists_f,), ref_tuple + (ref_dists,)):
        assert jnp.allclose(got, want, atol=1e-5, rtol=1e-5), (got, want)

    print("KERNEL_OK")
</pallas_src>

<mosaic_0001>
module attributes {stable_mosaic.version = 11 : i64} {
  func.func @_poincare_fused_kernel(%arg0: i32, %arg1: memref<32x64xf32, #tpu.memory_space<vmem>>, %arg2: memref<1x128xi32, #tpu.memory_space<vmem>>, %arg3: memref<1x128xi32, #tpu.memory_space<vmem>>, %arg4: memref<8x128xf32, #tpu.memory_space<vmem>>) attributes {dimension_semantics = [#tpu.dimension_semantics<parallel>], iteration_bounds = array<i64: 1>, scalar_prefetch = 0 : i64, scratch_operands = 0 : i64, tpu.core_type = #tpu.core_type<tc>, window_params = [{pipeline_mode = #tpu.pipeline_mode<synchronous>, transform_indices = @transform_0, window_bounds = array<i64: 32, 64>}, {transform_indices = @transform_1, window_bounds = array<i64: 1, 128>}, {transform_indices = @transform_2, window_bounds = array<i64: 1, 128>}, {transform_indices = @transform_3, window_bounds = array<i64: 8, 128>}]} {
    %c0 = arith.constant 0 : index
    %c0_0 = arith.constant 0 : index
    %0 = vector.load %arg1[%c0, %c0_0] : memref<32x64xf32, #tpu.memory_space<vmem>>, vector<32x64xf32>
    %1 = tpu.iota {dimensions = array<i32: 0>} : vector<64x128xi32>
    %c0_1 = arith.constant 0 : index
    %c0_2 = arith.constant 0 : index
    %2 = vector.load %arg2[%c0_1, %c0_2] : memref<1x128xi32, #tpu.memory_space<vmem>>, vector<1x128xi32>
    %3 = vector.broadcast %2 : vector<1x128xi32> to vector<64x128xi32>
    %4 = arith.cmpi eq, %1, %3 : vector<64x128xi32>
    %cst = arith.constant 1.000000e+00 : f32
    %cst_3 = arith.constant 0.000000e+00 : f32
    %5 = vector.broadcast %cst : f32 to vector<64x128xf32>
    %6 = vector.broadcast %cst_3 : f32 to vector<64x128xf32>
    %7 = arith.select %4, %5, %6 : vector<64x128xi1>, vector<64x128xf32>
    %c0_4 = arith.constant 0 : index
    %c0_5 = arith.constant 0 : index
    %8 = vector.load %arg3[%c0_4, %c0_5] : memref<1x128xi32, #tpu.memory_space<vmem>>, vector<1x128xi32>
    %9 = vector.broadcast %8 : vector<1x128xi32> to vector<64x128xi32>
    %10 = arith.cmpi eq, %1, %9 : vector<64x128xi32>
    %cst_6 = arith.constant 1.000000e+00 : f32
    %cst_7 = arith.constant 0.000000e+00 : f32
    %11 = vector.broadcast %cst_6 : f32 to vector<64x128xf32>
    %12 = vector.broadcast %cst_7 : f32 to vector<64x128xf32>
    %13 = arith.select %10, %11, %12 : vector<64x128xi1>, vector<64x128xf32>
    %cst_8 = arith.constant dense<0.000000e+00> : vector<32x128xf32>
    %14 = tpu.matmul %0, %7, %cst_8 {dimension_numbers = #tpu.dot_dimension_numbers<[1], [0], [0], [1], [0, 0, 1, 1], [], []>, precision = #tpu.contract_precision<fp32>} : vector<32x64xf32>, vector<64x128xf32>, vector<32x128xf32> -> vector<32x128xf32>
    %cst_9 = arith.constant dense<0.000000e+00> : vector<32x128xf32>
    %15 = tpu.matmul %0, %13, %cst_9 {dimension_numbers = #tpu.dot_dimension_numbers<[1], [0], [0], [1], [0, 0, 1, 1], [], []>, precision = #tpu.contract_precision<fp32>} : vector<32x64xf32>, vector<64x128xf32>, vector<32x128xf32> -> vector<32x128xf32>
    %16 = arith.mulf %14, %14 : vector<32x128xf32>
    %cst_10 = arith.constant dense<0.000000e+00> : vector<128xf32>
    %17 = vector.multi_reduction <add>, %16, %cst_10 [0] : vector<32x128xf32> to vector<128xf32>
    %18 = vector.shape_cast %17 : vector<128xf32> to vector<1x128xf32>
    %19 = arith.mulf %15, %15 : vector<32x128xf32>
    %cst_11 = arith.constant dense<0.000000e+00> : vector<128xf32>
    %20 = vector.multi_reduction <add>, %19, %cst_11 [0] : vector<32x128xf32> to vector<128xf32>
    %21 = vector.shape_cast %20 : vector<128xf32> to vector<1x128xf32>
    %22 = arith.mulf %14, %15 : vector<32x128xf32>
    %cst_12 = arith.constant dense<0.000000e+00> : vector<128xf32>
    %23 = vector.multi_reduction <add>, %22, %cst_12 [0] : vector<32x128xf32> to vector<128xf32>
    %24 = vector.shape_cast %23 : vector<128xf32> to vector<1x128xf32>
    %cst_13 = arith.constant 1.000000e+00 : f32
    %25 = vector.broadcast %cst_13 : f32 to vector<1x128xf32>
    %26 = arith.subf %25, %18 : vector<1x128xf32>
    %cst_14 = arith.constant 0.000000e+00 : f32
    %27 = vector.broadcast %cst_14 : f32 to vector<1x128xf32>
    %28 = arith.cmpf ole, %26, %27 : vector<1x128xf32>
    %cst_15 = arith.constant 9.99999974E-6 : f32
    %29 = vector.broadcast %cst_15 : f32 to vector<1x128xf32>
    %30 = arith.select %28, %29, %26 : vector<1x128xi1>, vector<1x128xf32>
    %cst_16 = arith.constant 1.000000e+00 : f32
    %31 = vector.broadcast %cst_16 : f32 to vector<1x128xf32>
    %32 = arith.subf %31, %21 : vector<1x128xf32>
    %cst_17 = arith.constant 0.000000e+00 : f32
    %33 = vector.broadcast %cst_17 : f32 to vector<1x128xf32>
    %34 = arith.cmpf ole, %32, %33 : vector<1x128xf32>
    %cst_18 = arith.constant 9.99999974E-6 : f32
    %35 = vector.broadcast %cst_18 : f32 to vector<1x128xf32>
    %36 = arith.select %34, %35, %32 : vector<1x128xi1>, vector<1x128xf32>
    %cst_19 = arith.constant 2.000000e+00 : f32
    %37 = vector.broadcast %cst_19 : f32 to vector<1x128xf32>
    %38 = arith.mulf %37, %24 : vector<1x128xf32>
    %39 = arith.subf %18, %38 : vector<1x128xf32>
    %40 = arith.addf %39, %21 : vector<1x128xf32>
    %cst_20 = arith.constant 2.000000e+00 : f32
    %41 = vector.broadcast %cst_20 : f32 to vector<1x128xf32>
    %42 = arith.mulf %41, %40 : vector<1x128xf32>
    %43 = arith.mulf %30, %36 : vector<1x128xf32>
    %44 = arith.divf %42, %43 : vector<1x128xf32>
    %cst_21 = arith.constant 1.000000e+00 : f32
    %45 = vector.broadcast %cst_21 : f32 to vector<1x128xf32>
    %46 = arith.addf %45, %44 : vector<1x128xf32>
    %cst_22 = arith.constant 1.000000e+00 : f32
    %47 = vector.broadcast %cst_22 : f32 to vector<1x128xf32>
    %48 = arith.maximumf %46, %47 : vector<1x128xf32>
    %49 = arith.mulf %48, %48 : vector<1x128xf32>
    %cst_23 = arith.constant 1.000000e+00 : f32
    %50 = vector.broadcast %cst_23 : f32 to vector<1x128xf32>
    %51 = arith.subf %49, %50 : vector<1x128xf32>
    %52 = math.sqrt %51 : vector<1x128xf32>
    %53 = arith.addf %48, %52 : vector<1x128xf32>
    %54 = math.log %53 : vector<1x128xf32>
    %c0_24 = arith.constant 0 : index
    %c0_25 = arith.constant 0 : index
    %55 = vector.load %arg4[%c0_24, %c0_25] : memref<8x128xf32, #tpu.memory_space<vmem>>, vector<1x128xf32>
    tpu.vector_store %arg4[%c0_24, %c0_25], %18 {strides = array<i32>} : memref<8x128xf32, #tpu.memory_space<vmem>>, vector<1x128xf32>,
    %c1 = arith.constant 1 : index
    %c0_26 = arith.constant 0 : index
    %56 = vector.load %arg4[%c1, %c0_26] : memref<8x128xf32, #tpu.memory_space<vmem>>, vector<1x128xf32>
    tpu.vector_store %arg4[%c1, %c0_26], %24 {strides = array<i32>} : memref<8x128xf32, #tpu.memory_space<vmem>>, vector<1x128xf32>,
    %c2 = arith.constant 2 : index
    %c0_27 = arith.constant 0 : index
    %57 = vector.load %arg4[%c2, %c0_27] : memref<8x128xf32, #tpu.memory_space<vmem>>, vector<1x128xf32>
    tpu.vector_store %arg4[%c2, %c0_27], %21 {strides = array<i32>} : memref<8x128xf32, #tpu.memory_space<vmem>>, vector<1x128xf32>,
    %c3 = arith.constant 3 : index
    %c0_28 = arith.constant 0 : index
    %58 = vector.load %arg4[%c3, %c0_28] : memref<8x128xf32, #tpu.memory_space<vmem>>, vector<1x128xf32>
    tpu.vector_store %arg4[%c3, %c0_28], %30 {strides = array<i32>} : memref<8x128xf32, #tpu.memory_space<vmem>>, vector<1x128xf32>,
    %c4 = arith.constant 4 : index
    %c0_29 = arith.constant 0 : index
    %59 = vector.load %arg4[%c4, %c0_29] : memref<8x128xf32, #tpu.memory_space<vmem>>, vector<1x128xf32>
    tpu.vector_store %arg4[%c4, %c0_29], %36 {strides = array<i32>} : memref<8x128xf32, #tpu.memory_space<vmem>>, vector<1x128xf32>,
    %c5 = arith.constant 5 : index
    %c0_30 = arith.constant 0 : index
    %60 = vector.load %arg4[%c5, %c0_30] : memref<8x128xf32, #tpu.memory_space<vmem>>, vector<1x128xf32>
    tpu.vector_store %arg4[%c5, %c0_30], %48 {strides = array<i32>} : memref<8x128xf32, #tpu.memory_space<vmem>>, vector<1x128xf32>,
    %c6 = arith.constant 6 : index
    %c0_31 = arith.constant 0 : index
    %61 = vector.load %arg4[%c6, %c0_31] : memref<8x128xf32, #tpu.memory_space<vmem>>, vector<1x128xf32>
    tpu.vector_store %arg4[%c6, %c0_31], %54 {strides = array<i32>} : memref<8x128xf32, #tpu.memory_space<vmem>>, vector<1x128xf32>,
    %cst_32 = arith.constant 0.000000e+00 : f32
    %62 = vector.broadcast %cst_32 : f32 to vector<1x128xf32>
    %c7 = arith.constant 7 : index
    %c0_33 = arith.constant 0 : index
    %63 = vector.load %arg4[%c7, %c0_33] : memref<8x128xf32, #tpu.memory_space<vmem>>, vector<1x128xf32>
    tpu.vector_store %arg4[%c7, %c0_33], %62 {strides = array<i32>} : memref<8x128xf32, #tpu.memory_space<vmem>>, vector<1x128xf32>,
    return
  }
  func.func @transform_0(%arg0: i32) -> (i32, i32) {
    %c0_i32 = arith.constant 0 : i32
    %c0_i32_0 = arith.constant 0 : i32
    %c0_i32_1 = arith.constant 0 : i32
    return %c0_i32, %c0_i32_0 : i32, i32
  }
  func.func @transform_1(%arg0: i32) -> (i32, i32) {
    %c0_i32 = arith.constant 0 : i32
    %c0_i32_0 = arith.constant 0 : i32
    return %c0_i32, %arg0 : i32, i32
  }
  func.func @transform_2(%arg0: i32) -> (i32, i32) {
    %c0_i32 = arith.constant 0 : i32
    %c0_i32_0 = arith.constant 0 : i32
    return %c0_i32, %arg0 : i32, i32
  }
  func.func @transform_3(%arg0: i32) -> (i32, i32) {
    %c0_i32 = arith.constant 0 : i32
    %c0_i32_0 = arith.constant 0 : i32
    return %c0_i32, %arg0 : i32, i32
  }
}

</mosaic_0001>

<bundles_post_ra>
// kernel: tpu_custom_call.1
= control target key start
LH: loop header
LB: loop body
LE: loop exit
PB: predicated region body
PF: predicated region fallthrough
CT: control target
= control target key end

     0   :  { %8 = vsyncpa [#allocation3], 0  ;;  %s2734_s0 = inlined_call_operand.hbm [shape: f32[32,64], index: 0, kind: input, shape index: {}]   ;;  %s2735_s1 = inlined_call_operand.vmem [shape: s32[1,128], index: 1, kind: input, shape index: {}]   ;;  %s2736_s2 = inlined_call_operand.vmem [shape: s32[1,128], index: 2, kind: input, shape index: {}]   ;;  %s2737_s3 = inlined_call_operand.hbm [shape: f32[8,128], index: 3, kind: output, shape index: {}]  }
   0x1   :  { %9 = vsyncpa [#allocation4], 0  ;;  %s1937_s12 = smov [#allocation2]  }
   0x2   :  { %s15_s13 = sshll.u32 %s1937_s12, 4  ;;  %s16_s13 = int_to_ptr.vmem [resolvable:$true] %s15_s13 }
   0x3   :  { %s1901_s14 = scalar_lea.vmem %s16_s13, 512  ;;  %p1906_p1 = scmp.lt.s32.totalorder %s16_s13, %s16_s13 }
   0x4   :  { %p1902_p0 = scmp.ne.s32.totalorder %s16_s13, %s1901_s14  ;;  %p1907_p2 = scmp.lt.s32.totalorder %s1901_s14, %s1901_s14 }
   0x6   :  { %p1908_p3 = por %p1907_p2, %p1906_p1 }
   0x8   :  { %p1909_p4 = pnand %p1908_p3, %p1902_p0 }
   0xa   :  { %1912 = shalt.err (!%p1909_p4)
}
   0xb   :  { %s1938_s15 = smov 128   ;;  %s1939_s16 = smov 8  }
   0xc   :  { %21 = dma.hbm_to_vmem [thread:$0]  %s2734_s0, 512, %s16_s13, [#allocation3], %s1938_s15, %s1938_s15, %s1939_s16  }
   0xd   :  { %1933 = dma.done.wait [#allocation3], 512  }
   0xe   :  { %1934 = vsyncadd [#allocation3], 4294966784  ;;  %v33_v0 = vlaneseq  ;;  %v1940_v1 = vmov 0.0   ;;  %v1422_v10 = vld [vmem:[%s2735_s1] ss:$0 sm:$0xff]  ;;  %vm84_vm0 = vcmask 523264  }
   0xf   :  { %1406 = vst [vmem:[#allocation5 + $0x7] sm:$0x1] %v1940_v1  ;;  %v29_v15 = vld [vmem:[#allocation2] sm:$0xff]  ;;  %v1941_v16 = vmov 1.0   ;;  %v30_v25 = vld [vmem:[#allocation2 + $0x8] sm:$0xff]  ;;  %v31_v53 = vld [vmem:[#allocation2 + $0x10] sm:$0xff] }
  0x10   :  { %v1967_v2 = vshrl.u32 %v33_v0, 7  ;;  %v86_v29 = vsel %vm84_vm0, %v29_v15, 0  ;;  %v89_v35 = vsel %vm84_vm0, %v30_v25, 0  ;;  %v32_v54 = vld [vmem:[#allocation2 + $0x18] sm:$0xff]  ;;  %v92_v0 = vsel %vm84_vm0, %v31_v53, 0 }
  0x11   :  { %v2072_v33 = vand.u32 4294901760, %v86_v29  ;;  %v2106_v43 = vand.u32 4294901760, %v89_v35 }
  0x12   :  { %v1970_v3 = vadd.s32 56, %v1967_v2  ;;  %v1973_v4 = vadd.s32 48, %v1967_v2  ;;  %v1976_v5 = vadd.s32 40, %v1967_v2  ;;  %v1979_v6 = vadd.s32 32, %v1967_v2 }
  0x13   :  { %v1982_v7 = vadd.s32 24, %v1967_v2  ;;  %v1985_v8 = vadd.s32 16, %v1967_v2  ;;  %v1988_v9 = vadd.s32 8, %v1967_v2  ;;  %vm2053_vm8 = vcmp.eq.s32.totalorder %v1967_v2, %v1422_v10  ;;  %1655 = vmatprep.mubr.f32.mxu1 %v2072_v33 }
  0x14   :  { %vm1994_vm1 = vcmp.eq.s32.totalorder %v1970_v3, %v1422_v10  ;;  %vm1999_vm2 = vcmp.eq.s32.totalorder %v1973_v4, %v1422_v10  ;;  %vm2004_vm3 = vcmp.eq.s32.totalorder %v1976_v5, %v1422_v10  ;;  %vm2009_vm4 = vcmp.eq.s32.totalorder %v1979_v6, %v1422_v10 }
  0x15   :  { %1617 = vmatprep.subr.msk.mxu0 %vm1994_vm1, %v1941_v16  ;;  %vm2017_vm5 = vcmp.eq.s32.totalorder %v1982_v7, %v1422_v10  ;;  %v62_v18 = vsel %vm1994_vm1, 1.0, %v1940_v1  ;;  %vm2025_vm6 = vcmp.eq.s32.totalorder %v1985_v8, %v1422_v10  ;;  %v61_v20 = vsel %vm1999_vm2, 1.0, %v1940_v1 }
  0x16   :  { %1618 = vmatpush3.msk.msra.mxu0 %vm1994_vm1, %v1941_v16  ;;  %v2035_v21 = vsub.f32 %v62_v18, %v62_v18  ;;  %v2037_v22 = vsub.f32 %v61_v20, %v61_v20  ;;  %vm2040_vm7 = vcmp.eq.s32.totalorder %v1988_v9, %v1422_v10  ;;  %v60_v24 = vsel %vm2004_vm3, 1.0, %v1940_v1 }
  0x17   :  { %1619 = vmatprep.subr.msk.mxu0 %vm1999_vm2, %v1941_v16  ;;  %v2050_v26 = vsub.f32 %v60_v24, %v60_v24  ;;  %v59_v28 = vsel %vm2009_vm4, 1.0, %v1940_v1  ;;  %v58_v36 = vsel %vm2017_vm5, 1.0, %v1940_v1  ;;  %v57_v37 = vsel %vm2025_vm6, 1.0, %v1940_v1 }
  0x18   :  { %1620 = vmatpush3.msk.msra.mxu0 %vm1999_vm2, %v1941_v16  ;;  %v2065_v30 = vand.u32 4294901760, %v2035_v21  ;;  %v2068_v31 = vand.u32 4294901760, %v2037_v22  ;;  %v2070_v32 = vsub.f32 %v59_v28, %v59_v28  ;;  %v2098_v41 = vsub.f32 %v86_v29, %v2072_v33 }
  0x19   :  { %1621 = vmatprep.subr.msk.mxu0 %vm2004_vm3, %v1941_v16  ;;  %v2078_v34 = vand.u32 4294901760, %v2050_v26  ;;  %v2108_v44 = vsub.f32 %v58_v36, %v58_v36  ;;  %v2110_v45 = vsub.f32 %v57_v37, %v57_v37  ;;  %v2124_v50 = vsub.f32 %v89_v35, %v2106_v43 }
  0x1a   :  { %1622 = vmatpush3.msk.msra.mxu0 %vm2004_vm3, %v1941_v16  ;;  %v221_v38 = vsub.f32 %v2035_v21, %v2065_v30  ;;  %v227_v39 = vsub.f32 %v2037_v22, %v2068_v31  ;;  %v2095_v40 = vand.u32 4294901760, %v2070_v32  ;;  %v2118_v49 = vand.u32 4294901760, %v2098_v41 }
  0x1b   :  { %1623 = vmatprep.subr.msk.mxu0 %vm2009_vm4, %v1941_v16  ;;  %v233_v42 = vsub.f32 %v2050_v26, %v2078_v34  ;;  %v2127_v51 = vand.u32 4294901760, %v2108_v44  ;;  %v2130_v52 = vand.u32 4294901760, %v2110_v45  ;;  %v56_v57 = vsel %vm2040_vm7, 1.0, %v1940_v1 }
  0x1c   :  { %1624 = vmatpush3.msk.msra.mxu0 %vm2009_vm4, %v1941_v16  ;;  %v222_v46 = vand.u32 4294901760, %v221_v38  ;;  %v228_v47 = vand.u32 4294901760, %v227_v39  ;;  %v239_v48 = vsub.f32 %v2070_v32, %v2095_v40  ;;  %v165_v56 = vsub.f32 %v2098_v41, %v2118_v49 }
  0x1d   :  { %1625 = vmatprep.subr.msk.mxu0 %vm2017_vm5, %v1941_v16  ;;  %v234_v55 = vand.u32 4294901760, %v233_v42  ;;  %v55_v58 = vsel %vm2053_vm8, 1.0, %v1940_v1  ;;  %v2147_v59 = vand.u32 4294901760, %v2124_v50  ;;  %v245_v60 = vsub.f32 %v2108_v44, %v2127_v51 }
  0x1e   :  { %1626 = vmatpush3.msk.msra.mxu0 %vm2017_vm5, %v1941_v16  ;;  %1639 = vmatprep.subr.mxu1 %v222_v46  ;;  %v2151_v61 = vsub.f32 %v56_v57, %v56_v57  ;;  %v240_v62 = vand.u32 4294901760, %v239_v48  ;;  %v2156_v63 = vsub.f32 %v55_v58, %v55_v58  ;;  %v95_v10 = vsel %vm84_vm0, %v32_v54, 0 }
  0x1f   :  { %1627 = vmatprep.subr.msk.mxu0 %vm2025_vm6, %v1941_v16  ;;  %1640 = vmatpush3.msra.mxu1 %v222_v46  ;;  %v2163_v15 = vand.u32 4294901760, %v165_v56  ;;  %v175_v18 = vsub.f32 %v2124_v50, %v2147_v59  ;;  %v251_v20 = vsub.f32 %v2110_v45, %v2130_v52  ;;  %v2178_v28 = vand.u32 4294901760, %v92_v0  ;;  %v2217_v56 = vld [vmem:[%s2736_s2] ss:$0 sm:$0xff]  ;;  %s1942_s2 = smov [#allocation5]  }
  0x20   :  { %1628 = vmatpush3.msk.msra.mxu0 %vm2025_vm6, %v1941_v16  ;;  %1641 = vmatprep.subr.mxu1 %v228_v47  ;;  %v2170_v24 = vand.u32 4294901760, %v2151_v61  ;;  %v2176_v25 = vand.u32 4294901760, %v2156_v63  ;;  %v2180_v29 = vand.u32 4294901760, %v95_v10  ;;  %v246_v36 = vand.u32 4294901760, %v245_v60  ;;  %s1413_s21 = sshll.u32 %s1942_s2, 4  ;;  %s1414_s21 = int_to_ptr.vmem [resolvable:$true] %s1413_s21 }
  0x21   :  { %1629 = vmatprep.subr.msk.mxu0 %vm2040_vm7, %v1941_v16  ;;  %1642 = vmatpush3.msra.mxu1 %v228_v47  ;;  %v2185_v35 = vand.u32 4294901760, %v175_v18  ;;  %v2193_v38 = vsub.f32 %v92_v0, %v2178_v28  ;;  %v252_v42 = vand.u32 4294901760, %v251_v20  ;;  %vm2222_vm9 = vcmp.eq.s32.totalorder %v1967_v2, %v2217_v56  ;;  %s1913_s22 = scalar_lea.vmem %s1414_s21, 128  ;;  %p1918_p6 = scmp.lt.s32.totalorder %s1414_s21, %s1414_s21 }
  0x22   :  { %1630 = vmatpush3.msk.msra.mxu0 %vm2040_vm7, %v1941_v16  ;;  %1643 = vmatprep.subr.mxu1 %v234_v55  ;;  %v257_v37 = vsub.f32 %v2151_v61, %v2170_v24  ;;  %v2196_v39 = vsub.f32 %v95_v10, %v2180_v29  ;;  %v263_v46 = vsub.f32 %v2156_v63, %v2176_v25  ;;  %v2236_v2 = vsel %vm2222_vm9, 1.0, %v1940_v1  ;;  %p1914_p5 = scmp.ne.s32.totalorder %s1414_s21, %s1913_s22  ;;  %p1919_p7 = scmp.lt.s32.totalorder %s1913_s22, %s1913_s22 }
  0x23   :  { %1631 = vmatprep.subr.msk.mxu0 %vm2053_vm8, %v1941_v16  ;;  %1644 = vmatpush3.msra.mxu1 %v234_v55  ;;  %v2204_v47 = vand.u32 4294901760, %v2193_v38  ;;  %vm2317_vm10 = vcmp.eq.s32.totalorder %v1970_v3, %v2217_v56  ;;  %vm2329_vm11 = vcmp.eq.s32.totalorder %v1973_v4, %v2217_v56  ;;  %vm2350_vm12 = vcmp.eq.s32.totalorder %v1976_v5, %v2217_v56 }
  0x24   :  { %1632 = vmatpush3.msk.msra.mxu0 %vm2053_vm8, %v1941_v16  ;;  %1645 = vmatprep.subr.mxu1 %v240_v62  ;;  %v258_v48 = vand.u32 4294901760, %v257_v37  ;;  %v2208_v53 = vand.u32 4294901760, %v2196_v39  ;;  %v264_v54 = vand.u32 4294901760, %v263_v46  ;;  %v83_v3 = vsel %vm2317_vm10, 1.0, %v1940_v1  ;;  %p1920_p8 = por %p1919_p7, %p1918_p6 }
  0x25   :  { %1633 = vmatprep.mubr.f32.mxu0 %v2163_v15  ;;  %1646 = vmatpush3.msra.mxu1 %v240_v62  ;;  %v185_v55 = vsub.f32 %v2193_v38, %v2204_v47  ;;  %v82_v11 = vsel %vm2329_vm11, 1.0, %v1940_v1  ;;  %vm2367_vm13 = vcmp.eq.s32.totalorder %v1979_v6, %v2217_v56  ;;  %vm2386_vm14 = vcmp.eq.s32.totalorder %v1982_v7, %v2217_v56 }
  0x26   :  { %1661 = vmatprep.subr.mxu0 %v2035_v21  ;;  %1634 = vmatmul.mubr.f32.vlgmr.msra.gmra.mxu0 %v2185_v35  ;;  %v2375_v12 = vsub.f32 %v82_v11, %v82_v11  ;;  %vm2408_vm15 = vcmp.eq.s32.totalorder %v1985_v8, %v2217_v56  ;;  %v79_v8 = vsel %vm2386_vm14, 1.0, %v1940_v1  ;;  %vm2432_vm0 = vcmp.eq.s32.totalorder %v1988_v9, %v2217_v56  ;;  %p1921_p9 = pnand %p1920_p8, %p1914_p5 }
  0x27   :  { %1647 = vmatprep.subr.mxu1 %v246_v36  ;;  %1662 = vmatpush3.msra.mxu0 %v2035_v21  ;;  %v2231_v57 = vand.u32 4294901760, %v185_v55  ;;  %v78_v9 = vsel %vm2408_vm15, 1.0, %v1940_v1  ;;  %v2456_v58 = vsub.f32 %v79_v8, %v79_v8  ;;  %v77_v19 = vsel %vm2432_vm0, 1.0, %v1940_v1 }
  0x28   :  { %1648 = vmatpush3.msra.mxu1 %v246_v36  ;;  %1663 = vmatprep.subr.mxu0 %v2037_v22  ;;  %v2478_v62 = vsub.f32 %v78_v9, %v78_v9  ;;  %v2497_v0 = vsub.f32 %v77_v19, %v77_v19  ;;  %v2514_v20 = vsub.f32 %v2236_v2, %v2236_v2 }
  0x29   :  { %1649 = vmatprep.subr.mxu1 %v252_v42  ;;  %1664 = vmatpush3.msra.mxu0 %v2037_v22  ;;  %v195_v22 = vsub.f32 %v2196_v39, %v2208_v53 }
  0x2a   :  { %1650 = vmatpush3.msra.mxu1 %v252_v42  ;;  %1665 = vmatprep.subr.mxu0 %v2050_v26  ;;  %v2510_v18 = vand.u32 4294901760, %v2478_v62  ;;  %v2525_v36 = vand.u32 4294901760, %v2497_v0  ;;  %v2534_v46 = vand.u32 4294901760, %v2514_v20 }
  0x2b   :  { %1651 = vmatprep.subr.mxu1 %v258_v48  ;;  %1666 = vmatpush3.msra.mxu0 %v2050_v26  ;;  %v2241_v26 = vand.u32 4294901760, %v195_v22 }
  0x2c   :  { %1652 = vmatpush3.msra.mxu1 %v258_v48  ;;  %1667 = vmatprep.subr.mxu0 %v2070_v32  ;;  %v869_v42 = vsub.f32 %v2478_v62, %v2510_v18  ;;  %v881_v56 = vsub.f32 %v2514_v20, %v2534_v46 }
  0x2d   :  { %1653 = vmatprep.subr.mxu1 %v264_v54  ;;  %1668 = vmatpush3.msra.mxu0 %v2070_v32  ;;  %v2359_v32 = vsub.f32 %v83_v3, %v83_v3 }
  0x2e   :  { %1654 = vmatpush3.msra.mxu1 %v264_v54  ;;  %1669 = vmatprep.subr.mxu0 %v2108_v44  ;;  %v875_v54 = vsub.f32 %v2497_v0, %v2525_v36  ;;  %v870_v55 = vand.u32 4294901760, %v869_v42  ;;  %v882_v2 = vand.u32 4294901760, %v881_v56 }
  0x2f   :  { %1656 = vmatmul.mubr.f32.vlgmr.msra.gmra.mxu1 %v2106_v43  ;;  %1670 = vmatpush3.msra.mxu0 %v2108_v44  ;;  %v2395_v13 = vand.u32 4294901760, %v2359_v32  ;;  %v2421_v44 = vand.u32 4294901760, %v2375_v12 }
  0x30   :  { %1683 = vmatprep.subr.msk.mxu1 %vm1994_vm1, %v1941_v16  ;;  %1671 = vmatprep.subr.mxu0 %v2110_v45  ;;  %v876_v22 = vand.u32 4294901760, %v875_v54 }
  0x31   :  { %1684 = vmatpush3.msk.msra.mxu1 %vm1994_vm1, %v1941_v16  ;;  %1636 = vmatprep.mubr.f32.mxu0 %v2231_v57  ;;  %v845_v60 = vsub.f32 %v2375_v12, %v2421_v44 }
  0x32   :  { %1672 = vmatpush3.msra.mxu0 %v2110_v45  ;;  %1685 = vmatprep.subr.msk.mxu1 %vm1999_vm2, %v1941_v16 }
  0x33   :  { %1637 = vmatmul.mubr.f32.gmra.mxu0 %v2241_v26  ;;  %1673 = vmatprep.subr.mxu0 %v2151_v61  ;;  %v846_v10 = vand.u32 4294901760, %v845_v60 }
  0x34   :  { %1686 = vmatpush3.msk.msra.mxu1 %vm1999_vm2, %v1941_v16  ;;  %1674 = vmatpush3.msra.mxu0 %v2151_v61 }
  0x35   :  { %1687 = vmatprep.subr.msk.mxu1 %vm2004_vm3, %v1941_v16  ;;  %1675 = vmatprep.subr.mxu0 %v2156_v63 }
  0x36   :  { %1688 = vmatpush3.msk.msra.mxu1 %vm2004_vm3, %v1941_v16  ;;  %1676 = vmatpush3.msra.mxu0 %v2156_v63  ;;  %v2495_v63 = vand.u32 4294901760, %v2456_v58 }
  0x37   :  { %1677 = vmatprep.mubr.f32.mxu0 %v2098_v41  ;;  %1689 = vmatprep.subr.msk.mxu1 %vm2009_vm4, %v1941_v16 }
  0x38   :  { %1678 = vmatmul.mubr.f32.vlgmr.msra.gmra.mxu0 %v2124_v50  ;;  %1690 = vmatpush3.msk.msra.mxu1 %vm2009_vm4, %v1941_v16 }
  0x39   :  { %1705 = vmatprep.subr.mxu0 %v2065_v30  ;;  %1658 = vmatprep.mubr.f32.mxu1 %v2178_v28 }
  0x3a   :  { %1691 = vmatprep.subr.msk.mxu1 %vm2017_vm5, %v1941_v16  ;;  %1706 = vmatpush3.msra.mxu0 %v2065_v30 }
  0x3b   :  { %1659 = vmatmul.mubr.f32.gmra.mxu1 %v2180_v29  ;;  %1707 = vmatprep.subr.mxu0 %v2068_v31 }
  0x3c   :  { %1692 = vmatpush3.msk.msra.mxu1 %vm2017_vm5, %v1941_v16  ;;  %1680 = vmatprep.mubr.f32.mxu0 %v2193_v38 }
  0x3d   :  { %1693 = vmatprep.subr.msk.mxu1 %vm2025_vm6, %v1941_v16  ;;  %1708 = vmatpush3.msra.mxu0 %v2068_v31 }
  0x3e   :  { %1681 = vmatmul.mubr.f32.gmra.mxu0 %v2196_v39  ;;  %1694 = vmatpush3.msk.msra.mxu1 %vm2025_vm6, %v1941_v16 }
  0x3f   :  { %1709 = vmatprep.subr.mxu0 %v2078_v34  ;;  %1695 = vmatprep.subr.msk.mxu1 %vm2040_vm7, %v1941_v16 }
  0x40   :  { %1710 = vmatpush3.msra.mxu0 %v2078_v34  ;;  %1696 = vmatpush3.msk.msra.mxu1 %vm2040_vm7, %v1941_v16  ;;  %v81_v34 = vsel %vm2350_vm12, 1.0, %v1940_v1 }
  0x41   :  { %1711 = vmatprep.subr.mxu0 %v2095_v40  ;;  %1697 = vmatprep.subr.msk.mxu1 %vm2053_vm8, %v1941_v16  ;;  %v2412_v14 = vsub.f32 %v81_v34, %v81_v34 }
  0x42   :  { %1712 = vmatpush3.msra.mxu0 %v2095_v40  ;;  %1698 = vmatpush3.msk.msra.mxu1 %vm2053_vm8, %v1941_v16  ;;  %v80_v40 = vsel %vm2367_vm13, 1.0, %v1940_v1 }
  0x43   :  { %1699 = vmatprep.mubr.f32.mxu1 %v2118_v49  ;;  %1713 = vmatprep.subr.mxu0 %v2127_v51  ;;  %v2436_v17 = vsub.f32 %v80_v40, %v80_v40 }
  0x44   :  { %1700 = vmatmul.mubr.f32.vlgmr.msra.gmra.mxu1 %v2147_v59  ;;  %1714 = vmatpush3.msra.mxu0 %v2127_v51  ;;  %v839_v51 = vsub.f32 %v2359_v32, %v2395_v13 }
  0x45   :  { %1727 = vmatprep.subr.msk.mxu1 %vm1994_vm1, %v1941_v16  ;;  %1715 = vmatprep.subr.mxu0 %v2130_v52  ;;  %v2476_v61 = vand.u32 4294901760, %v2436_v17 }
  0x46   :  { %1728 = vmatpush3.msk.msra.mxu1 %vm1994_vm1, %v1941_v16  ;;  %1716 = vmatpush3.msra.mxu0 %v2130_v52  ;;  %v2454_v52 = vand.u32 4294901760, %v2412_v14  ;;  %v840_v1 = vand.u32 4294901760, %v839_v51 }
  0x47   :  { %1729 = vmatprep.subr.msk.mxu1 %vm1999_vm2, %v1941_v16  ;;  %1702 = vmatprep.mubr.f32.mxu1 %v2204_v47  ;;  %v857_v27 = vsub.f32 %v2436_v17, %v2476_v61 }
  0x48   :  { %1717 = vmatprep.subr.mxu0 %v2170_v24  ;;  %1730 = vmatpush3.msk.msra.mxu1 %vm1999_vm2, %v1941_v16  ;;  %v851_v23 = vsub.f32 %v2412_v14, %v2454_v52 }
  0x49   :  { %1703 = vmatmul.mubr.f32.gmra.mxu1 %v2208_v53  ;;  %1718 = vmatpush3.msra.mxu0 %v2170_v24  ;;  %v858_v37 = vand.u32 4294901760, %v857_v27 }
  0x4a   :  { %1731 = vmatprep.subr.msk.mxu1 %vm2004_vm3, %v1941_v16  ;;  %1719 = vmatprep.subr.mxu0 %v2176_v25  ;;  %v852_v24 = vand.u32 4294901760, %v851_v23 }
  0x4b   :  { %1732 = vmatpush3.msk.msra.mxu1 %vm2004_vm3, %v1941_v16  ;;  %1720 = vmatpush3.msra.mxu0 %v2176_v25  ;;  %v863_v25 = vsub.f32 %v2456_v58, %v2495_v63 }
  0x4c   :  { %1721 = vmatprep.mubr.f32.mxu0 %v2072_v33  ;;  %1733 = vmatprep.subr.msk.mxu1 %vm2009_vm4, %v1941_v16 }
  0x4d   :  { %1722 = vmatmul.mubr.f32.vlgmr.msra.gmra.mxu0 %v2106_v43  ;;  %1734 = vmatpush3.msk.msra.mxu1 %vm2009_vm4, %v1941_v16  ;;  %v864_v48 = vand.u32 4294901760, %v863_v25 }
  0x4e   :  { %1749 = vmatprep.subr.msk.mxu0 %vm2317_vm10, %v1941_v16  ;;  %1735 = vmatprep.subr.msk.mxu1 %vm2017_vm5, %v1941_v16 }
  0x4f   :  { %1750 = vmatpush3.msk.msra.mxu0 %vm2317_vm10, %v1941_v16  ;;  %1736 = vmatpush3.msk.msra.mxu1 %vm2017_vm5, %v1941_v16 }
  0x50   :  { %1751 = vmatprep.subr.msk.mxu0 %vm2329_vm11, %v1941_v16  ;;  %1724 = vmatprep.mubr.f32.mxu0 %v2178_v28 }
  0x51   :  { %1737 = vmatprep.subr.msk.mxu1 %vm2025_vm6, %v1941_v16  ;;  %1752 = vmatpush3.msk.msra.mxu0 %vm2329_vm11, %v1941_v16 }
  0x52   :  { %1725 = vmatmul.mubr.f32.gmra.mxu0 %v2180_v29  ;;  %1738 = vmatpush3.msk.msra.mxu1 %vm2025_vm6, %v1941_v16 }
  0x53   :  { %1753 = vmatprep.subr.msk.mxu0 %vm2350_vm12, %v1941_v16  ;;  %1739 = vmatprep.subr.msk.mxu1 %vm2040_vm7, %v1941_v16 }
  0x54   :  { %1754 = vmatpush3.msk.msra.mxu0 %vm2350_vm12, %v1941_v16  ;;  %1740 = vmatpush3.msk.msra.mxu1 %vm2040_vm7, %v1941_v16 }
  0x55   :  { %1755 = vmatprep.subr.msk.mxu0 %vm2367_vm13, %v1941_v16  ;;  %1741 = vmatprep.subr.msk.mxu1 %vm2053_vm8, %v1941_v16 }
  0x56   :  { %1756 = vmatpush3.msk.msra.mxu0 %vm2367_vm13, %v1941_v16  ;;  %1742 = vmatpush3.msk.msra.mxu1 %vm2053_vm8, %v1941_v16 }
  0x57   :  { %1743 = vmatprep.mubr.f32.mxu1 %v2072_v33  ;;  %1757 = vmatprep.subr.msk.mxu0 %vm2386_vm14, %v1941_v16 }
  0x58   :  { %1744 = vmatmul.mubr.f32.vlgmr.msra.gmra.mxu1 %v2106_v43  ;;  %1758 = vmatpush3.msk.msra.mxu0 %vm2386_vm14, %v1941_v16 }
  0x59   :  { %1771 = vmatprep.subr.mxu1 %v840_v1  ;;  %1759 = vmatprep.subr.msk.mxu0 %vm2408_vm15, %v1941_v16 }
  0x5a   :  { %1772 = vmatpush3.msra.mxu1 %v840_v1  ;;  %1760 = vmatpush3.msk.msra.mxu0 %vm2408_vm15, %v1941_v16 }
  0x5b   :  { %1773 = vmatprep.subr.mxu1 %v846_v10  ;;  %1746 = vmatprep.mubr.f32.mxu1 %v2178_v28 }
  0x5c   :  { %1761 = vmatprep.subr.msk.mxu0 %vm2432_vm0, %v1941_v16  ;;  %1774 = vmatpush3.msra.mxu1 %v846_v10 }
  0x5d   :  { %1747 = vmatmul.mubr.f32.gmra.mxu1 %v2180_v29  ;;  %1762 = vmatpush3.msk.msra.mxu0 %vm2432_vm0, %v1941_v16 }
  0x5e   :  { %1775 = vmatprep.subr.mxu1 %v852_v24  ;;  %1763 = vmatprep.subr.msk.mxu0 %vm2222_vm9, %v1941_v16 }
  0x5f   :  { %1776 = vmatpush3.msra.mxu1 %v852_v24  ;;  %1764 = vmatpush3.msk.msra.mxu0 %vm2222_vm9, %v1941_v16 }
  0x60   :  { %1777 = vmatprep.subr.mxu1 %v858_v37  ;;  %1765 = vmatprep.mubr.f32.mxu0 %v2163_v15 }
  0x61   :  { %1778 = vmatpush3.msra.mxu1 %v858_v37  ;;  %1793 = vmatprep.subr.mxu0 %v2359_v32 }
  0x62   :  { %1766 = vmatmul.mubr.f32.vlgmr.msra.gmra.mxu0 %v2185_v35  ;;  %1779 = vmatprep.subr.mxu1 %v864_v48 }
  0x63   :  { %1794 = vmatpush3.msra.mxu0 %v2359_v32  ;;  %1780 = vmatpush3.msra.mxu1 %v864_v48 }
  0x64   :  { %1795 = vmatprep.subr.mxu0 %v2375_v12  ;;  %1781 = vmatprep.subr.mxu1 %v870_v55 }
  0x65   :  { %1796 = vmatpush3.msra.mxu0 %v2375_v12  ;;  %1782 = vmatpush3.msra.mxu1 %v870_v55 }
  0x66   :  { %1797 = vmatprep.subr.mxu0 %v2412_v14  ;;  %1783 = vmatprep.subr.mxu1 %v876_v22 }
  0x67   :  { %1798 = vmatpush3.msra.mxu0 %v2412_v14  ;;  %1784 = vmatpush3.msra.mxu1 %v876_v22 }
  0x68   :  { %1799 = vmatprep.subr.mxu0 %v2436_v17  ;;  %1785 = vmatprep.subr.mxu1 %v882_v2 }
  0x69   :  { %1800 = vmatpush3.msra.mxu0 %v2436_v17  ;;  %1786 = vmatpush3.msra.mxu1 %v882_v2 }
  0x6a   :  { %1787 = vmatprep.mubr.f32.mxu1 %v2072_v33  ;;  %1801 = vmatprep.subr.mxu0 %v2456_v58 }
  0x6b   :  { %1788 = vmatmul.mubr.f32.vlgmr.msra.gmra.mxu1 %v2106_v43  ;;  %1802 = vmatpush3.msra.mxu0 %v2456_v58 }
  0x6c   :  { %1815 = vmatprep.subr.msk.mxu1 %vm2317_vm10, %v1941_v16  ;;  %1803 = vmatprep.subr.mxu0 %v2478_v62 }
  0x6d   :  { %1816 = vmatpush3.msk.msra.mxu1 %vm2317_vm10, %v1941_v16  ;;  %1768 = vmatprep.mubr.f32.mxu0 %v2231_v57 }
  0x6e   :  { %1804 = vmatpush3.msra.mxu0 %v2478_v62  ;;  %1817 = vmatprep.subr.msk.mxu1 %vm2329_vm11, %v1941_v16 }
  0x6f   :  { %1769 = vmatmul.mubr.f32.gmra.mxu0 %v2241_v26  ;;  %1805 = vmatprep.subr.mxu0 %v2497_v0 }
  0x70   :  { %1818 = vmatpush3.msk.msra.mxu1 %vm2329_vm11, %v1941_v16  ;;  %1806 = vmatpush3.msra.mxu0 %v2497_v0 }
  0x71   :  { %1819 = vmatprep.subr.msk.mxu1 %vm2350_vm12, %v1941_v16  ;;  %1807 = vmatprep.subr.mxu0 %v2514_v20 }
  0x72   :  { %1820 = vmatpush3.msk.msra.mxu1 %vm2350_vm12, %v1941_v16  ;;  %1808 = vmatpush3.msra.mxu0 %v2514_v20 }
  0x73   :  { %1809 = vmatprep.mubr.f32.mxu0 %v2098_v41  ;;  %1821 = vmatprep.subr.msk.mxu1 %vm2367_vm13, %v1941_v16 }
  0x74   :  { %1810 = vmatmul.mubr.f32.vlgmr.msra.gmra.mxu0 %v2124_v50  ;;  %1822 = vmatpush3.msk.msra.mxu1 %vm2367_vm13, %v1941_v16 }
  0x75   :  { %1837 = vmatprep.subr.mxu0 %v2395_v13  ;;  %1790 = vmatprep.mubr.f32.mxu1 %v2178_v28 }
  0x76   :  { %1823 = vmatprep.subr.msk.mxu1 %vm2386_vm14, %v1941_v16  ;;  %1838 = vmatpush3.msra.mxu0 %v2395_v13 }
  0x77   :  { %1791 = vmatmul.mubr.f32.gmra.mxu1 %v2180_v29  ;;  %1839 = vmatprep.subr.mxu0 %v2421_v44 }
  0x78   :  { %1824 = vmatpush3.msk.msra.mxu1 %vm2386_vm14, %v1941_v16  ;;  %1812 = vmatprep.mubr.f32.mxu0 %v2193_v38 }
  0x79   :  { %1825 = vmatprep.subr.msk.mxu1 %vm2408_vm15, %v1941_v16  ;;  %1840 = vmatpush3.msra.mxu0 %v2421_v44 }
  0x7a   :  { %1813 = vmatmul.mubr.f32.gmra.mxu0 %v2196_v39  ;;  %1826 = vmatpush3.msk.msra.mxu1 %vm2408_vm15, %v1941_v16 }
  0x7b   :  { %1841 = vmatprep.subr.mxu0 %v2454_v52  ;;  %1827 = vmatprep.subr.msk.mxu1 %vm2432_vm0, %v1941_v16 }
  0x7c   :  { %1842 = vmatpush3.msra.mxu0 %v2454_v52  ;;  %1828 = vmatpush3.msk.msra.mxu1 %vm2432_vm0, %v1941_v16 }
  0x7d   :  { %1843 = vmatprep.subr.mxu0 %v2476_v61  ;;  %1829 = vmatprep.subr.msk.mxu1 %vm2222_vm9, %v1941_v16 }
  0x7e   :  { %1844 = vmatpush3.msra.mxu0 %v2476_v61  ;;  %1830 = vmatpush3.msk.msra.mxu1 %vm2222_vm9, %v1941_v16 }
  0x7f   :  { %1831 = vmatprep.mubr.f32.mxu1 %v2118_v49  ;;  %1845 = vmatprep.subr.mxu0 %v2495_v63 }
  0x80   :  { %1832 = vmatmul.mubr.f32.vlgmr.msra.gmra.mxu1 %v2147_v59  ;;  %1846 = vmatpush3.msra.mxu0 %v2495_v63 }
  0x81   :  { %1859 = vmatprep.subr.msk.mxu1 %vm2317_vm10, %v1941_v16  ;;  %1847 = vmatprep.subr.mxu0 %v2510_v18 }
  0x82   :  { %1860 = vmatpush3.msk.msra.mxu1 %vm2317_vm10, %v1941_v16  ;;  %1848 = vmatpush3.msra.mxu0 %v2510_v18 }
  0x83   :  { %1861 = vmatprep.subr.msk.mxu1 %vm2329_vm11, %v1941_v16  ;;  %1834 = vmatprep.mubr.f32.mxu1 %v2204_v47 }
  0x84   :  { %1849 = vmatprep.subr.mxu0 %v2525_v36  ;;  %1862 = vmatpush3.msk.msra.mxu1 %vm2329_vm11, %v1941_v16 }
  0x85   :  { %1835 = vmatmul.mubr.f32.gmra.mxu1 %v2208_v53  ;;  %1850 = vmatpush3.msra.mxu0 %v2525_v36 }
  0x86   :  { %1863 = vmatprep.subr.msk.mxu1 %vm2350_vm12, %v1941_v16  ;;  %1851 = vmatprep.subr.mxu0 %v2534_v46 }
  0x87   :  { %1864 = vmatpush3.msk.msra.mxu1 %vm2350_vm12, %v1941_v16  ;;  %1852 = vmatpush3.msra.mxu0 %v2534_v46 }
  0x88   :  { %1853 = vmatprep.mubr.f32.mxu0 %v2072_v33  ;;  %1865 = vmatprep.subr.msk.mxu1 %vm2367_vm13, %v1941_v16 }
  0x89   :  { %1854 = vmatmul.mubr.f32.vlgmr.msra.gmra.mxu0 %v2106_v43  ;;  %1866 = vmatpush3.msk.msra.mxu1 %vm2367_vm13, %v1941_v16 }
  0x8a   :  { %1867 = vmatprep.subr.msk.mxu1 %vm2386_vm14, %v1941_v16  ;;  %1856 = vmatprep.mubr.f32.mxu0 %v2178_v28 }
  0x8b   :  { %1868 = vmatpush3.msk.msra.mxu1 %vm2386_vm14, %v1941_v16  ;;  %1875 = vmatprep.mubr.f32.mxu1 %v2072_v33 }
  0x8c   :  { %1869 = vmatprep.subr.msk.mxu1 %vm2408_vm15, %v1941_v16 }
  0x8d   :  { %1857 = vmatmul.mubr.f32.gmra.mxu0 %v2180_v29  ;;  %1870 = vmatpush3.msk.msra.mxu1 %vm2408_vm15, %v1941_v16 }
  0x8e   :  { %1871 = vmatprep.subr.msk.mxu1 %vm2432_vm0, %v1941_v16 }
  0x8f   :  { %1872 = vmatpush3.msk.msra.mxu1 %vm2432_vm0, %v1941_v16 }
  0x90   :  { %1873 = vmatprep.subr.msk.mxu1 %vm2222_vm9, %v1941_v16 }
  0x91   :  { %1874 = vmatpush3.msk.msra.mxu1 %vm2222_vm9, %v1941_v16 }
  0x92   :  { %1876 = vmatmul.mubr.f32.vlgmr.msra.gmra.mxu1 %v2106_v43 }
  0x93   :  { %1878 = vmatprep.mubr.f32.mxu1 %v2178_v28 }
  0x96   :  { %1879 = vmatmul.mubr.f32.gmra.mxu1 %v2180_v29 }
  0xe6   :  { %v1635_v33 = vpop.f32.mrf.mxu0 }
  0xe8   :  { %v168_v41 = vpop.f32.mrf.mxu0 }
  0xef   :  { %v1657_v59 = vpop.f32.mrf.mxu1 }
  0xf0   :  { %v308_v31 = vadd.f32 %v1657_v59, %v1635_v33 }
  0xf1   :  { %v301_v35 = vpop.f32.mrf.mxu1 }
  0xf2   :  { %v302_v30 = vadd.f32 %v301_v35, %v168_v41 }
  0xf3   :  { %v1638_v49 = vpop.f32.mrf.mxu0 }
  0xf5   :  { %v188_v50 = vpop.f32.mrf.mxu0 }
  0xf8   :  { %v1679_v15 = vpop.f32.mrf.mxu0 }
  0xf9   :  { %v407_v3 = vadd.f32 %v1679_v15, %v308_v31 }
  0xfa   :  { %v399_v39 = vpop.f32.mrf.mxu0 }
  0xfb   :  { %v1660_v38 = vpop.f32.mrf.mxu1  ;;  %v400_v29 = vadd.f32 %v399_v39, %v302_v30 }
  0xfc   :  { %v320_v4 = vadd.f32 %v1660_v38, %v1638_v49 }
  0xfd   :  { %v313_v47 = vpop.f32.mrf.mxu1 }
  0xfe   :  { %v1682_v53 = vpop.f32.mrf.mxu0  ;;  %v314_v11 = vadd.f32 %v313_v47, %v188_v50 }
  0xff   :  { %v421_v40 = vadd.f32 %v1682_v53, %v320_v4 }
 0x100   :  { %v413_v21 = vpop.f32.mrf.mxu0 }
 0x101   :  { %v414_v7 = vadd.f32 %v413_v21, %v314_v11 }
 0x104   :  { %v1701_v57 = vpop.f32.mrf.mxu1 }
 0x105   :  { %v502_v34 = vadd.f32 %v1701_v57, %v407_v3 }
 0x106   :  { %v493_v16 = vpop.f32.mrf.mxu1 }
 0x107   :  { %v494_v5 = vadd.f32 %v493_v16, %v400_v29 }
 0x109   :  { %v1704_v43 = vpop.f32.mrf.mxu1 }
 0x10a   :  { %v518_v17 = vadd.f32 %v1704_v43, %v421_v40 }
 0x10b   :  { %v509_v32 = vpop.f32.mrf.mxu1 }
 0x10c   :  { %v510_v51 = vadd.f32 %v509_v32, %v414_v7 }
 0x10d   :  { %v1723_v26 = vpop.f32.mrf.mxu0 }
 0x10e   :  { %v611_v14 = vadd.f32 %v1723_v26, %v502_v34 }
 0x10f   :  { %v604_v28 = vpop.f32.mrf.mxu0 }
 0x110   :  { %v605_v13 = vadd.f32 %v604_v28, %v494_v5 }
 0x112   :  { %v1726_v12 = vpop.f32.mrf.mxu0 }
 0x113   :  { %v623_v58 = vadd.f32 %v1726_v12, %v518_v17 }
 0x114   :  { %v616_v8 = vpop.f32.mrf.mxu0 }
 0x115   :  { %v617_v60 = vadd.f32 %v616_v8, %v510_v51 }
 0x118   :  { %v1745_v6 = vpop.f32.mrf.mxu1 }
 0x119   :  { %v2704_v9 = vadd.f32 %v1745_v6, %v611_v14 }
 0x11a   :  { %v693_v44 = vpop.f32.mrf.mxu1 }
 0x11b   :  { %v2702_v45 = vadd.f32 %v693_v44, %v605_v13  ;;  %v1334_v62 = vmul.f32 %v2704_v9, %v2704_v9 }
 0x11d   :  { %v1748_v52 = vpop.f32.mrf.mxu1  ;;  %v1333_v19 = vmul.f32 %v2702_v45, %v2702_v45 }
 0x11e   :  { %v2710_v1 = vadd.f32 %v1748_v52, %v623_v58 }
 0x11f   :  { %v705_v61 = vpop.f32.mrf.mxu1  ;;  %v1337_v63 = vadd.f32 %v1334_v62, %v1333_v19 }
 0x120   :  { %v2712_v23 = vadd.f32 %v705_v61, %v617_v60  ;;  %v1336_v10 = vmul.f32 %v2710_v1, %v2710_v1 }
 0x122   :  { %v1335_v0 = vmul.f32 %v2712_v23, %v2712_v23  ;;  %v1767_v36 = vpop.f32.mrf.mxu0 }
 0x124   :  { %v1338_v27 = vadd.f32 %v1337_v63, %v1335_v0  ;;  %v786_v46 = vpop.f32.mrf.mxu0 }
 0x126   :  { %v1339_v18 = vadd.f32 %v1338_v27, %v1336_v10 }
 0x128   :  { %v1340_v20 = vrot.slane %v1339_v18, 4 }
 0x12a   :  { %v1341_v24 = vadd.f32 %v1340_v20, %v1339_v18 }
 0x12b   :  { %v1789_v2 = vpop.f32.mrf.mxu1 }
 0x12c   :  { %v1342_v25 = vrot.slane %v1341_v24, 2  ;;  %v926_v16 = vadd.f32 %v1789_v2, %v1767_v36 }
 0x12d   :  { %v919_v41 = vpop.f32.mrf.mxu1 }
 0x12e   :  { %v1343_v37 = vadd.f32 %v1342_v25, %v1341_v24  ;;  %v920_v57 = vadd.f32 %v919_v41, %v786_v46 }
 0x12f   :  { %v1770_v54 = vpop.f32.mrf.mxu0 }
 0x130   :  { %v1344_v42 = vrot.slane %v1343_v37, 1 }
 0x131   :  { %v806_v22 = vpop.f32.mrf.mxu0 }
 0x132   :  { %v2718_v48 = vadd.f32 %v1344_v42, %v1343_v37 }
 0x134   :  { %v1372_v55 = vsub.f32 1.0, %v2718_v48  ;;  %1399 = vst [vmem:[#allocation5] sm:$0x1] %v2718_v48  ;;  %v1811_v33 = vpop.f32.mrf.mxu0 }
 0x135   :  { %v1025_v43 = vadd.f32 %v1811_v33, %v926_v16 }
 0x136   :  { %vm1373_vm1 = vcmp.le.f32.partialorder %v1372_v55, 0.0  ;;  %v1017_v50 = vpop.f32.mrf.mxu0 }
 0x137   :  { %v2722_v56 = vsel %vm1373_vm1, 1e-05, %v1372_v55  ;;  %v1792_v49 = vpop.f32.mrf.mxu1  ;;  %v1018_v26 = vadd.f32 %v1017_v50, %v920_v57 }
 0x138   :  { %1402 = vst [vmem:[#allocation5 + $0x3] sm:$0x1] %v2722_v56  ;;  %v938_v30 = vadd.f32 %v1792_v49, %v1770_v54 }
 0x139   :  { %v931_v59 = vpop.f32.mrf.mxu1 }
 0x13a   :  { %v1814_v15 = vpop.f32.mrf.mxu0  ;;  %v932_v28 = vadd.f32 %v931_v59, %v806_v22 }
 0x13b   :  { %v1039_v5 = vadd.f32 %v1814_v15, %v938_v30 }
 0x13c   :  { %v1031_v38 = vpop.f32.mrf.mxu0 }
 0x13d   :  { %v1032_v12 = vadd.f32 %v1031_v38, %v932_v28 }
 0x140   :  { %v1833_v35 = vpop.f32.mrf.mxu1 }
 0x141   :  { %v1120_v4 = vadd.f32 %v1833_v35, %v1025_v43 }
 0x142   :  { %v1111_v39 = vpop.f32.mrf.mxu1 }
 0x143   :  { %v1112_v29 = vadd.f32 %v1111_v39, %v1018_v26 }
 0x145   :  { %v1836_v53 = vpop.f32.mrf.mxu1 }
 0x146   :  { %v1136_v7 = vadd.f32 %v1836_v53, %v1039_v5 }
 0x147   :  { %v1127_v31 = vpop.f32.mrf.mxu1 }
 0x148   :  { %v1128_v14 = vadd.f32 %v1127_v31, %v1032_v12 }
 0x149   :  { %v1855_v47 = vpop.f32.mrf.mxu0 }
 0x14a   :  { %v1229_v34 = vadd.f32 %v1855_v47, %v1120_v4 }
 0x14b   :  { %v1222_v21 = vpop.f32.mrf.mxu0 }
 0x14c   :  { %v1223_v32 = vadd.f32 %v1222_v21, %v1112_v29 }
 0x14d   :  { %v1858_v3 = vpop.f32.mrf.mxu0 }
 0x14e   :  { %v1241_v17 = vadd.f32 %v1858_v3, %v1136_v7 }
 0x14f   :  { %v1234_v13 = vpop.f32.mrf.mxu0 }
 0x150   :  { %v1235_v51 = vadd.f32 %v1234_v13, %v1128_v14 }
 0x152   :  { %v1877_v11 = vpop.f32.mrf.mxu1 }
 0x153   :  { %v1318_v44 = vadd.f32 %v1877_v11, %v1229_v34 }
 0x154   :  { %v1311_v6 = vpop.f32.mrf.mxu1 }
 0x155   :  { %v1312_v40 = vadd.f32 %v1311_v6, %v1223_v32  ;;  %v1347_v19 = vmul.f32 %v1318_v44, %v1318_v44  ;;  %v1360_v61 = vmul.f32 %v1318_v44, %v2704_v9 }
 0x156   :  { %v1880_v8 = vpop.f32.mrf.mxu1 }
 0x157   :  { %v1346_v52 = vmul.f32 %v1312_v40, %v1312_v40  ;;  %v1359_v58 = vmul.f32 %v1312_v40, %v2702_v45  ;;  %v1330_v62 = vadd.f32 %v1880_v8, %v1241_v17 }
 0x158   :  { %v1323_v60 = vpop.f32.mrf.mxu1 }
 0x159   :  { %v1324_v63 = vadd.f32 %v1323_v60, %v1235_v51  ;;  %v1350_v0 = vadd.f32 %v1347_v19, %v1346_v52  ;;  %v1363_v10 = vadd.f32 %v1360_v61, %v1359_v58  ;;  %v1349_v20 = vmul.f32 %v1330_v62, %v1330_v62 }
 0x15a   :  { %v1362_v24 = vmul.f32 %v1330_v62, %v2710_v1 }
 0x15b   :  { %v1348_v27 = vmul.f32 %v1324_v63, %v1324_v63  ;;  %v1361_v18 = vmul.f32 %v1324_v63, %v2712_v23 }
 0x15d   :  { %v1351_v25 = vadd.f32 %v1350_v0, %v1348_v27  ;;  %v1364_v36 = vadd.f32 %v1363_v10, %v1361_v18 }
 0x15f   :  { %v1352_v37 = vadd.f32 %v1351_v25, %v1349_v20  ;;  %v1365_v42 = vadd.f32 %v1364_v36, %v1362_v24 }
 0x161   :  { %v1353_v46 = vrot.slane %v1352_v37, 4  ;;  %v1366_v45 = vrot.slane %v1365_v42, 4 }
 0x163   :  { %v1354_v54 = vadd.f32 %v1353_v46, %v1352_v37  ;;  %v1367_v55 = vadd.f32 %v1366_v45, %v1365_v42 }
 0x165   :  { %v1355_v22 = vrot.slane %v1354_v54, 2  ;;  %v1368_v9 = vrot.slane %v1367_v55, 2 }
 0x167   :  { %v1356_v2 = vadd.f32 %v1355_v22, %v1354_v54  ;;  %v1369_v33 = vadd.f32 %v1368_v9, %v1367_v55 }
 0x169   :  { %v1357_v41 = vrot.slane %v1356_v2, 1  ;;  %v1370_v49 = vrot.slane %v1369_v33, 1 }
 0x16b   :  { %v1358_v50 = vadd.f32 %v1357_v41, %v1356_v2  ;;  %v1371_v59 = vadd.f32 %v1370_v49, %v1369_v33 }
 0x16d   :  { %v1375_v23 = vsub.f32 1.0, %v1358_v50  ;;  %1400 = vst [vmem:[#allocation5 + $0x1] sm:$0x1] %v1371_v59  ;;  %1401 = vst [vmem:[#allocation5 + $0x2] sm:$0x1] %v1358_v50  ;;  %v1378_v35 = vmul.f32 2.0, %v1371_v59 }
 0x16f   :  { %vm1376_vm2 = vcmp.le.f32.partialorder %v1375_v23, 0.0  ;;  %v1379_v38 = vsub.f32 %v2718_v48, %v1378_v35 }
 0x170   :  { %v1377_v1 = vsel %vm1376_vm2, 1e-05, %v1375_v23 }
 0x171   :  { %v1382_v15 = vmul.f32 %v1377_v1, %v2722_v56  ;;  %1403 = vst [vmem:[#allocation5 + $0x4] sm:$0x1] %v1377_v1  ;;  %v1380_v39 = vadd.f32 %v1379_v38, %v1358_v50 }
 0x173   :  { %1887 = vrcp.f32 %v1382_v15  ;;  %v1381_v47 = vmul.f32 2.0, %v1380_v39 }
 0x180   :  { %v1888_v53 = vpop.eup %1887 }
 0x181   :  { %v1384_v57 = vmul.f32 %v1888_v53, %v1381_v47 }
 0x183   :  { %v1385_v21 = vadd.f32 1.0, %v1384_v57 }
 0x185   :  { %v1386_v16 = vmax.f32 %v1385_v21, 1.0 }
 0x187   :  { %v1387_v26 = vmul.f32 %v1386_v16, %v1386_v16  ;;  %1404 = vst [vmem:[#allocation5 + $0x5] sm:$0x1] %v1386_v16 }
 0x189   :  { %v1472_v43 = vadd.f32 -1.0, %v1387_v26 }
 0x18b   :  { %1889 = vrsqrt.f32 %v1472_v43  ;;  %vm1391_vm3 = vcmp.eq.f32.partialorder %v1472_v43, inf  ;;  %v1394_v31 = vand.u32 2147483648, %v1472_v43  ;;  %vm1393_vm4 = vcmp.eq.f32.partialorder %v1472_v43, 0.0 }
 0x198   :  { %v1890_v30 = vpop.eup %1889 }
 0x199   :  { %v1390_v28 = vmul.f32 %v1890_v30, %v1472_v43 }
 0x19b   :  { %v1392_v56 = vsel %vm1391_vm3, %v1472_v43, %v1390_v28 }
 0x19c   :  { %v1395_v29 = vsel %vm1393_vm4, %v1394_v31, %v1392_v56 }
 0x19d   :  { %v1396_v3 = vadd.f32 %v1395_v29, %v1386_v16 }
 0x19f   :  { %1891 = vlog2.f32 %v1396_v3 }
 0x1ac   :  { %v1892_v48 = vpop.eup %1891 }
 0x1ad   :  { %v1398_v4 = vmul.f32 0.6931472, %v1892_v48 }
 0x1af   :  { %1405 = vst [vmem:[#allocation5 + $0x6] sm:$0x1] %v1398_v4 }
 0x1b0   :  { %1924 = shalt.err (!%p1921_p9)
}
 0x1b1   :  { %1416 = dma.vmem_to_hbm [thread:$0]  %s1414_s21, 128, %s2737_s3, [#allocation4]  }
 0x1b2   :  { %1935 = dma.done.wait [#allocation4], 128  }
 0x1b3   :  { %1936 = vsyncadd [#allocation4], 4294967168 }
 0x1b4   :  { %1420 = vsyncpa [#allocation3], 1 }
 0x1b5   :  { %1421 = vsyncpa [#allocation4], 1 }

</bundles_post_ra>
